<compile_context>
chip_gen: v6e
topology: v6e:2x2x1
jax: 0.10.0
libtpu: 0.0.40
codegen_flags: <defaults>
</compile_context>

<pallas_src>
import functools
import math

import jax
import jax.numpy as jnp
from jax.experimental import pallas as pl
from jax.experimental.pallas import tpu as pltpu


# --------------------------------------------------------------------------
# Helpers
# --------------------------------------------------------------------------

def _round_up(x, m):
    return (x + m - 1) // m * m


def _pad2(x, rows, cols):
    x = jnp.asarray(x)
    r, c = x.shape
    if r == rows and c == cols:
        return x
    return jnp.pad(x, ((0, rows - r), (0, cols - c)))


def _vmem_capacity_bytes():
    """Physical VMEM of the attached TPU; conservative 64 MiB (v7x) fallback."""
    try:
        if jax.devices()[0].platform == "tpu":
            cap = getattr(pltpu.get_tpu_info(), "vmem_capacity_bytes", None)
            if cap:
                return int(cap)
    except Exception:
        pass
    return 64 * 1024 * 1024


def _choose_tiles(n):
    """Returns (Np, tm, tk): padded node count, row tile, contraction tile."""
    np128 = _round_up(n, 128)
    if np128 <= 1024:                        # toy sizes: single tile
        return np128, np128, np128
    if n <= 16384:                           # medium graphs
        return _round_up(n, 1024), 512, 1024
    return _round_up(n, 2048), 1024, 2048    # large graphs: HBM-bound, go big


# --------------------------------------------------------------------------
# Fused layer kernel:
#   ego = A @ X        (bf16 MXU inputs, f32 VMEM accumulator)
#   if perturbed: ego += sign(ego) * F.normalize(noise, dim=-1) * eps
#   if write_ego: ego_out = bf16(ego)
#   acc_out = (acc_in + ego) * acc_scale    (acc_scale = 1/n_layers on last)
# --------------------------------------------------------------------------

def _layer_kernel(*refs, eps, perturbed, acc_scale, write_ego, x_resident, tk):
    refs = list(refs)
    noise_ref = refs.pop(0) if perturbed else None
    a_ref = refs.pop(0)
    x_ref = refs.pop(0)
    acc_prev_ref = refs.pop(0)
    ego_ref = refs.pop(0) if write_ego else None
    acc_out_ref = refs.pop(0)
    acc_sc = refs.pop(0)

    # NOTE: program_id / num_programs only at the top level (interpret-safe).
    k = pl.program_id(1)
    last_k = pl.num_programs(1) - 1

    @pl.when(k == 0)
    def _init():
        acc_sc[...] = jnp.zeros_like(acc_sc)

    if x_resident:
        x_blk = x_ref[pl.ds(k * tk, tk), :]      # slice the VMEM-resident X
    else:
        x_blk = x_ref[...]
    acc_sc[...] += jnp.dot(a_ref[...], x_blk,
                           preferred_element_type=jnp.float32)

    @pl.when(k == last_k)
    def _epilogue():
        ego = acc_sc[...]
        if perturbed:
            noise = noise_ref[...]
            # F.normalize(noise, dim=-1); padded lanes/rows of noise are zero.
            inv = jax.lax.rsqrt(jnp.maximum(
                jnp.sum(noise * noise, axis=-1, keepdims=True),
                jnp.float32(1e-24)))
            ego = ego + jnp.sign(ego) * (noise * inv) * jnp.float32(eps)
        if write_ego:
            ego_ref[...] = ego.astype(ego_ref.dtype)
        out = acc_prev_ref[...] + ego
        if acc_scale != 1.0:
            out = out * jnp.float32(acc_scale)
        acc_out_ref[...] = out


def _build_layer_call(*, Np, Dp, tm, tk, eps, perturbed, write_ego, acc_scale,
                      x_resident, x_dtype, vmem_limit):
    kern = functools.partial(
        _layer_kernel, eps=eps, perturbed=perturbed, acc_scale=acc_scale,
        write_ego=write_ego, x_resident=x_resident, tk=tk)

    in_specs = []
    if perturbed:
        in_specs.append(pl.BlockSpec((tm, Dp), lambda i, k: (i, 0)))   # noise
    in_specs.append(pl.BlockSpec((tm, tk), lambda i, k: (i, k)))       # A tile
    if x_resident:
        in_specs.append(pl.BlockSpec((Np, Dp), lambda i, k: (0, 0)))   # X full
    else:
        in_specs.append(pl.BlockSpec((tk, Dp), lambda i, k: (k, 0)))   # X strip
    in_specs.append(pl.BlockSpec((tm, Dp), lambda i, k: (i, 0)))       # acc_in

    if write_ego:
        out_shape = (jax.ShapeDtypeStruct((Np, Dp), x_dtype),          # ego
                     jax.ShapeDtypeStruct((Np, Dp), jnp.float32))      # acc
        out_specs = (pl.BlockSpec((tm, Dp), lambda i, k: (i, 0)),
                     pl.BlockSpec((tm, Dp), lambda i, k: (i, 0)))
    else:
        out_shape = jax.ShapeDtypeStruct((Np, Dp), jnp.float32)        # acc
        out_specs = pl.BlockSpec((tm, Dp), lambda i, k: (i, 0))

    return pl.pallas_call(
        kern,
        out_shape=out_shape,
        grid=(Np // tm, Np // tk),
        in_specs=in_specs,
        out_specs=out_specs,
        scratch_shapes=[pltpu.VMEM((tm, Dp), jnp.float32)],
        compiler_params=pltpu.CompilerParams(
            dimension_semantics=("parallel", "arbitrary"),
            vmem_limit_bytes=vmem_limit),
    )


# --------------------------------------------------------------------------
# Row-tiled L2-normalize + scale over the padded (Np, Dp) slab.
# --------------------------------------------------------------------------

def _norm_scale_kernel(x_ref, o_ref, *, scale):
    x = x_ref[...]
    inv = jax.lax.rsqrt(jnp.maximum(
        jnp.sum(x * x, axis=-1, keepdims=True), jnp.float32(1e-24)))
    o_ref[...] = x * inv * jnp.float32(scale)


def _build_norm_call(*, Np, Dp, tr, scale):
    return pl.pallas_call(
        functools.partial(_norm_scale_kernel, scale=scale),
        out_shape=jax.ShapeDtypeStruct((Np, Dp), jnp.float32),
        grid=(Np // tr,),
        in_specs=[pl.BlockSpec((tr, Dp), lambda i: (i, 0))],
        out_specs=pl.BlockSpec((tr, Dp), lambda i: (i, 0)),
        compiler_params=pltpu.CompilerParams(
            dimension_semantics=("parallel",)),
    )


# --------------------------------------------------------------------------
# Parameter init (mirrors nn.init.xavier_uniform_)
# --------------------------------------------------------------------------

def xavier_uniform(key, shape, dtype=jnp.float32):
    fan_in, fan_out = shape
    bound = math.sqrt(6.0 / (fan_in + fan_out))
    return jax.random.uniform(key, shape, dtype, minval=-bound, maxval=bound)


class SimGCLEncoderPallas:
    compute_dtype = jnp.bfloat16   # HBM-streaming / MXU dtype (accum is f32)

    def __init__(self, user_num, item_num, emb_size, eps, n_layers, scale,
                 norm_adj, key, tile_override=None, x_resident=None):
        self.user_num = int(user_num)
        self.item_num = int(item_num)
        self.emb_size = int(emb_size)
        self.eps = float(eps)
        self.n_layers = int(n_layers)
        self.scale = float(scale)
        self.N = self.user_num + self.item_num
        self.Dp = _round_up(self.emb_size, 128)

        if tile_override is None:
            self.Np, self.tm, self.tk = _choose_tiles(self.N)
        else:
            self.tm, self.tk = tile_override
            self.Np = _round_up(self.N, math.lcm(self.tm, self.tk))

        # Per-generation VMEM budgeting (128 MiB v5e/v6e, 64 MiB per-TC v7x).
        cap = _vmem_capacity_bytes()
        bf = jnp.dtype(self.compute_dtype).itemsize
        x_bytes = self.Np * self.Dp * bf
        if x_resident is None:
            x_resident = (self.Np > self.tm and self.Np > self.tk
                          and 2 * x_bytes <= cap // 4)
        self.x_resident = bool(x_resident)

        est = (2 * self.tm * self.tk * bf                              # A
               + 2 * (x_bytes if self.x_resident else self.tk * self.Dp * bf)
               + 2 * self.tm * self.Dp * (4 + 4 + 4 + bf)              # noise/acc_in/acc_out/ego
               + self.tm * self.Dp * 4)                                # scratch
        self.vmem_limit = int(min(cap * 3 // 4, est + (16 << 20)))

        # Dense, zero-padded bf16 normalized adjacency for the MXU (hoisted).
        self.norm_adj = jnp.asarray(norm_adj, jnp.float32)
        self.adj_p = _pad2(self.norm_adj, self.Np, self.Np).astype(
            self.compute_dtype)

        k1, k2, k3 = jax.random.split(key, 3)
        self.user_emb = xavier_uniform(k1, (self.user_num, self.emb_size))
        self.item_emb = xavier_uniform(k2, (self.item_num, self.emb_size))
        # Initialized for parity with the PyTorch module; unused in forward().
        self.item_bias = xavier_uniform(k3, (self.item_num, 1))

        # Hoisted concat + pad of the initial ego embeddings.
        ego0 = jnp.concatenate([self.user_emb, self.item_emb], axis=0)
        self.ego0_p = _pad2(ego0, self.Np, self.Dp).astype(self.compute_dtype)

        self._fwd = jax.jit(self._forward_impl, static_argnames=("perturbed",))

    # ---------------------------------------------------------------- forward
    def _forward_impl(self, adj_p, ego0_p, key, perturbed):
        Np, Dp, L = self.Np, self.Dp, self.n_layers

        noise_p = None
        if perturbed:
            # torch.rand_like equivalent, one draw per layer, padded with 0s.
            noise = jax.random.uniform(
                key, (L, self.N, self.emb_size), jnp.float32)
            noise_p = jnp.pad(
                noise, ((0, 0), (0, Np - self.N), (0, Dp - self.emb_size)))

        ego = ego0_p
        acc = jnp.zeros((Np, Dp), jnp.float32)
        for layer in range(L):
            is_last = layer == L - 1
            call = _build_layer_call(
                Np=Np, Dp=Dp, tm=self.tm, tk=self.tk, eps=self.eps,
                perturbed=bool(perturbed), write_ego=not is_last,
                acc_scale=(1.0 / L) if is_last else 1.0,
                x_resident=self.x_resident, x_dtype=self.compute_dtype,
                vmem_limit=self.vmem_limit)
            args = ([noise_p[layer]] if perturbed else []) + [adj_p, ego, acc]
            out = call(*args)
            if is_last:
                acc = out                      # already scaled by 1/n_layers
            else:
                ego, acc = out

        # Users: plain mean.  Items: L2-normalize * scale (row-tiled kernel
        # over the already lane-dense padded slab; padded lanes/rows are 0).
        user_all = acc[:self.user_num, :self.emb_size]
        tr = Np if Np <= 1024 else math.gcd(Np, 1024)
        normed = _build_norm_call(Np=Np, Dp=Dp, tr=tr, scale=self.scale)(acc)
        item_all = normed[self.user_num:self.user_num + self.item_num,
                          :self.emb_size]
        return user_all, item_all

    def forward(self, perturbed=False, key=None):
        if perturbed and key is None:
            raise ValueError("perturbed forward needs a PRNG key")
        if key is None:
            key = jax.random.PRNGKey(0)        # unused when perturbed=False
        return self._fwd(self.adj_p, self.ego0_p, key,
                         perturbed=bool(perturbed))


# --------------------------------------------------------------------------
# Pure-JAX reference (mirrors the kernel's bf16 MXU inputs / f32 accumulation)
# --------------------------------------------------------------------------

def _reference_forward(norm_adj, user_emb, item_emb, n_layers, eps, scale,
                       noise=None):
    A16 = jnp.asarray(norm_adj, jnp.float32).astype(jnp.bfloat16)
    ego_b = jnp.concatenate([user_emb, item_emb], 0).astype(jnp.bfloat16)
    acc = jnp.zeros((ego_b.shape[0], user_emb.shape[1]), jnp.float32)
    for layer in range(n_layers):
        ego_f = jnp.dot(A16, ego_b, preferred_element_type=jnp.float32)
        if noise is not None:
            nl = noise[layer]
            nl = nl / jnp.maximum(
                jnp.linalg.norm(nl, axis=-1, keepdims=True), 1e-12)
            ego_f = ego_f + jnp.sign(ego_f) * nl * eps
        acc = acc + ego_f
        ego_b = ego_f.astype(jnp.bfloat16)
    all_emb = acc * (1.0 / n_layers)
    u = all_emb[:user_emb.shape[0]]
    it = all_emb[user_emb.shape[0]:]
    it = it / jnp.maximum(jnp.linalg.norm(it, axis=-1, keepdims=True),
                          1e-12) * scale
    return u, it


def _make_norm_adj(key, user_num, item_num):
    """Synthetic bipartite graph -> symmetric normalized dense adjacency."""
    R = jax.random.bernoulli(key, 0.3, (user_num, item_num)).astype(jnp.float32)
    N = user_num + item_num
    A = jnp.zeros((N, N), jnp.float32)
    A = A.at[:user_num, user_num:].set(R)
    A = A.at[user_num:, :user_num].set(R.T)
    deg = A.sum(axis=1)
    d_inv_sqrt = jnp.where(deg > 0, 1.0 / jnp.sqrt(deg), 0.0)
    return d_inv_sqrt[:, None] * A * d_inv_sqrt[None, :]


def _assert_close(name, got, want, atol=1e-3, rtol=1e-2, max_bad_frac=0.0):
    got = jnp.asarray(got, jnp.float32)
    want = jnp.asarray(want, jnp.float32)
    assert bool(jnp.all(jnp.isfinite(got))), f"{name}: non-finite output"
    err = jnp.abs(got - want)
    tol = atol + rtol * jnp.abs(want)
    bad_frac = float(jnp.mean((err > tol).astype(jnp.float32)))
    assert bad_frac <= max_bad_frac, (
        f"{name}: {bad_frac * 100:.3f}% elements out of tolerance, "
        f"max_err={float(err.max()):.3e}")


def _run_case(seed, user_num, item_num, emb_size, n_layers, eps, scale,
              tile_override=None, x_resident=None, check_perturbed=True):
    key = jax.random.PRNGKey(seed)
    k_adj, k_params, k_noise = jax.random.split(key, 3)
    norm_adj = _make_norm_adj(k_adj, user_num, item_num)
    enc = SimGCLEncoderPallas(user_num, item_num, emb_size, eps, n_layers,
                              scale, norm_adj, k_params,
                              tile_override=tile_override,
                              x_resident=x_resident)

    u, it = enc.forward(perturbed=False)
    jax.block_until_ready((u, it))
    assert u.shape == (user_num, emb_size)
    assert it.shape == (item_num, emb_size)
    ru, rit = _reference_forward(norm_adj, enc.user_emb, enc.item_emb,
                                 n_layers, eps, scale)
    _assert_close("user", u, ru)
    _assert_close("item", it, rit)

    if check_perturbed:
        up, itp = enc.forward(perturbed=True, key=k_noise)
        jax.block_until_ready((up, itp))
        noise = jax.random.uniform(
            k_noise, (n_layers, user_num + item_num, emb_size), jnp.float32)
        rup, ritp = _reference_forward(norm_adj, enc.user_emb, enc.item_emb,
                                       n_layers, eps, scale, noise=noise)
        # A tiny fraction of elements may legitimately flip sign(ego) near 0
        # due to f32/bf16 summation-order differences; allow 0.5%.
        _assert_close("perturbed user", up, rup, max_bad_frac=0.005)
        _assert_close("perturbed item", itp, ritp, max_bad_frac=0.005)


# --------------------------------------------------------------------------
# Main
# --------------------------------------------------------------------------

if __name__ == "__main__":
    # 1) Small single-tile case (default tiling heuristic).
    _run_case(seed=0, user_num=24, item_num=40, emb_size=32,
              n_layers=2, eps=0.1, scale=0.5)

    # 2) Multi-tile case (3x3 grid, K-split accumulator) with VMEM-resident X.
    _run_case(seed=1, user_num=150, item_num=230, emb_size=64,
              n_layers=2, eps=0.1, scale=1.0,
              tile_override=(128, 128), x_resident=True)

    # 3) Same geometry with the streaming-X (large-graph) path.
    _run_case(seed=2, user_num=150, item_num=230, emb_size=64,
              n_layers=2, eps=0.1, scale=1.0,
              tile_override=(128, 128), x_resident=False,
              check_perturbed=False)

    print("KERNEL_OK")
</pallas_src>

<mosaic_0001>
module attributes {stable_mosaic.version = 11 : i64} {
  func.func @_layer_kernel(%arg0: i32, %arg1: i32, %arg2: memref<128x128xbf16, #tpu.memory_space<vmem>>, %arg3: memref<128x128xbf16, #tpu.memory_space<vmem>>, %arg4: memref<128x128xf32, #tpu.memory_space<vmem>>, %arg5: memref<128x128xf32, #tpu.memory_space<vmem>>, %arg6: memref<128x128xf32, #tpu.memory_space<vmem>>) attributes {dimension_semantics = [#tpu.dimension_semantics<parallel>, #tpu.dimension_semantics<arbitrary>], iteration_bounds = array<i64: 1, 1>, scalar_prefetch = 0 : i64, scratch_operands = 1 : i64, tpu.core_type = #tpu.core_type<tc>, window_params = [{transform_indices = @transform_0, window_bounds = array<i64: 128, 128>}, {transform_indices = @transform_1, window_bounds = array<i64: 128, 128>}, {transform_indices = @transform_2, window_bounds = array<i64: 128, 128>}, {transform_indices = @transform_3, window_bounds = array<i64: 128, 128>}]} {
    %c0_i32 = arith.constant 0 : i32
    %0 = arith.cmpi eq, %arg1, %c0_i32 : i32
    %1 = arith.extui %0 : i1 to i32
    %c0_i32_0 = arith.constant 0 : i32
    %2 = arith.cmpi ne, %1, %c0_i32_0 : i32
    scf.if %2 {
      %cst_10 = arith.constant 0.000000e+00 : f32
      %12 = vector.broadcast %cst_10 : f32 to vector<128x128xf32>
      %c0_11 = arith.constant 0 : index
      %c0_12 = arith.constant 0 : index
      %13 = vector.load %arg6[%c0_11, %c0_12] : memref<128x128xf32, #tpu.memory_space<vmem>>, vector<128x128xf32>
      tpu.vector_store %arg6[%c0_11, %c0_12], %12 {strides = array<i32>} : memref<128x128xf32, #tpu.memory_space<vmem>>, vector<128x128xf32>,
    } else {
    }
    %c0 = arith.constant 0 : index
    %c0_1 = arith.constant 0 : index
    %3 = vector.load %arg3[%c0, %c0_1] : memref<128x128xbf16, #tpu.memory_space<vmem>>, vector<128x128xbf16>
    %c0_2 = arith.constant 0 : index
    %c0_3 = arith.constant 0 : index
    %4 = vector.load %arg6[%c0_2, %c0_3] : memref<128x128xf32, #tpu.memory_space<vmem>>, vector<128x128xf32>
    %c0_4 = arith.constant 0 : index
    %c0_5 = arith.constant 0 : index
    %5 = vector.load %arg2[%c0_4, %c0_5] : memref<128x128xbf16, #tpu.memory_space<vmem>>, vector<128x128xbf16>
    %cst = arith.constant dense<0.000000e+00> : vector<128x128xf32>
    %6 = tpu.matmul %5, %3, %cst {dimension_numbers = #tpu.dot_dimension_numbers<[1], [0], [0], [1], [0, 0, 1, 1], [], []>} : vector<128x128xbf16>, vector<128x128xbf16>, vector<128x128xf32> -> vector<128x128xf32>
    %7 = arith.addf %4, %6 : vector<128x128xf32>
    %c0_6 = arith.constant 0 : index
    %c0_7 = arith.constant 0 : index
    %8 = vector.load %arg6[%c0_6, %c0_7] : memref<128x128xf32, #tpu.memory_space<vmem>>, vector<128x128xf32>
    tpu.vector_store %arg6[%c0_6, %c0_7], %7 {strides = array<i32>} : memref<128x128xf32, #tpu.memory_space<vmem>>, vector<128x128xf32>,
    %c0_i32_8 = arith.constant 0 : i32
    %9 = arith.cmpi eq, %arg1, %c0_i32_8 : i32
    %10 = arith.extui %9 : i1 to i32
    %c0_i32_9 = arith.constant 0 : i32
    %11 = arith.cmpi ne, %10, %c0_i32_9 : i32
    scf.if %11 {
      %c0_10 = arith.constant 0 : index
      %c0_11 = arith.constant 0 : index
      %12 = vector.load %arg6[%c0_10, %c0_11] : memref<128x128xf32, #tpu.memory_space<vmem>>, vector<128x128xf32>
      %c0_12 = arith.constant 0 : index
      %c0_13 = arith.constant 0 : index
      %13 = vector.load %arg4[%c0_12, %c0_13] : memref<128x128xf32, #tpu.memory_space<vmem>>, vector<128x128xf32>
      %14 = arith.addf %13, %12 : vector<128x128xf32>
      %cst_14 = arith.constant 5.000000e-01 : f32
      %15 = vector.broadcast %cst_14 : f32 to vector<128x128xf32>
      %16 = arith.mulf %14, %15 : vector<128x128xf32>
      %c0_15 = arith.constant 0 : index
      %c0_16 = arith.constant 0 : index
      %17 = vector.load %arg5[%c0_15, %c0_16] : memref<128x128xf32, #tpu.memory_space<vmem>>, vector<128x128xf32>
      tpu.vector_store %arg5[%c0_15, %c0_16], %16 {strides = array<i32>} : memref<128x128xf32, #tpu.memory_space<vmem>>, vector<128x128xf32>,
    } else {
    }
    return
  }
  func.func @transform_0(%arg0: i32, %arg1: i32) -> (i32, i32) {
    %c0_i32 = arith.constant 0 : i32
    return %arg0, %arg1 : i32, i32
  }
  func.func @transform_1(%arg0: i32, %arg1: i32) -> (i32, i32) {
    %c0_i32 = arith.constant 0 : i32
    %c0_i32_0 = arith.constant 0 : i32
    return %arg1, %c0_i32 : i32, i32
  }
  func.func @transform_2(%arg0: i32, %arg1: i32) -> (i32, i32) {
    %c0_i32 = arith.constant 0 : i32
    %c0_i32_0 = arith.constant 0 : i32
    return %arg0, %c0_i32 : i32, i32
  }
  func.func @transform_3(%arg0: i32, %arg1: i32) -> (i32, i32) {
    %c0_i32 = arith.constant 0 : i32
    %c0_i32_0 = arith.constant 0 : i32
    return %arg0, %c0_i32 : i32, i32
  }
}

module attributes {stable_mosaic.version = 11 : i64} {
  func.func @_layer_kernel(%arg0: i32, %arg1: i32, %arg2: memref<128x128xbf16, #tpu.memory_space<vmem>>, %arg3: memref<128x128xbf16, #tpu.memory_space<vmem>>, %arg4: memref<128x128xf32, #tpu.memory_space<vmem>>, %arg5: memref<128x128xbf16, #tpu.memory_space<vmem>>, %arg6: memref<128x128xf32, #tpu.memory_space<vmem>>, %arg7: memref<128x128xf32, #tpu.memory_space<vmem>>) attributes {dimension_semantics = [#tpu.dimension_semantics<parallel>, #tpu.dimension_semantics<arbitrary>], iteration_bounds = array<i64: 1, 1>, scalar_prefetch = 0 : i64, scratch_operands = 1 : i64, tpu.core_type = #tpu.core_type<tc>, window_params = [{transform_indices = @transform_0, window_bounds = array<i64: 128, 128>}, {transform_indices = @transform_1, window_bounds = array<i64: 128, 128>}, {transform_indices = @transform_2, window_bounds = array<i64: 128, 128>}, {transform_indices = @transform_3, window_bounds = array<i64: 128, 128>}, {transform_indices = @transform_4, window_bounds = array<i64: 128, 128>}]} {
    %c0_i32 = arith.constant 0 : i32
    %0 = arith.cmpi eq, %arg1, %c0_i32 : i32
    %1 = arith.extui %0 : i1 to i32
    %c0_i32_0 = arith.constant 0 : i32
    %2 = arith.cmpi ne, %1, %c0_i32_0 : i32
    scf.if %2 {
      %cst_10 = arith.constant 0.000000e+00 : f32
      %12 = vector.broadcast %cst_10 : f32 to vector<128x128xf32>
      %c0_11 = arith.constant 0 : index
      %c0_12 = arith.constant 0 : index
      %13 = vector.load %arg7[%c0_11, %c0_12] : memref<128x128xf32, #tpu.memory_space<vmem>>, vector<128x128xf32>
      tpu.vector_store %arg7[%c0_11, %c0_12], %12 {strides = array<i32>} : memref<128x128xf32, #tpu.memory_space<vmem>>, vector<128x128xf32>,
    } else {
    }
    %c0 = arith.constant 0 : index
    %c0_1 = arith.constant 0 : index
    %3 = vector.load %arg3[%c0, %c0_1] : memref<128x128xbf16, #tpu.memory_space<vmem>>, vector<128x128xbf16>
    %c0_2 = arith.constant 0 : index
    %c0_3 = arith.constant 0 : index
    %4 = vector.load %arg7[%c0_2, %c0_3] : memref<128x128xf32, #tpu.memory_space<vmem>>, vector<128x128xf32>
    %c0_4 = arith.constant 0 : index
    %c0_5 = arith.constant 0 : index
    %5 = vector.load %arg2[%c0_4, %c0_5] : memref<128x128xbf16, #tpu.memory_space<vmem>>, vector<128x128xbf16>
    %cst = arith.constant dense<0.000000e+00> : vector<128x128xf32>
    %6 = tpu.matmul %5, %3, %cst {dimension_numbers = #tpu.dot_dimension_numbers<[1], [0], [0], [1], [0, 0, 1, 1], [], []>} : vector<128x128xbf16>, vector<128x128xbf16>, vector<128x128xf32> -> vector<128x128xf32>
    %7 = arith.addf %4, %6 : vector<128x128xf32>
    %c0_6 = arith.constant 0 : index
    %c0_7 = arith.constant 0 : index
    %8 = vector.load %arg7[%c0_6, %c0_7] : memref<128x128xf32, #tpu.memory_space<vmem>>, vector<128x128xf32>
    tpu.vector_store %arg7[%c0_6, %c0_7], %7 {strides = array<i32>} : memref<128x128xf32, #tpu.memory_space<vmem>>, vector<128x128xf32>,
    %c0_i32_8 = arith.constant 0 : i32
    %9 = arith.cmpi eq, %arg1, %c0_i32_8 : i32
    %10 = arith.extui %9 : i1 to i32
    %c0_i32_9 = arith.constant 0 : i32
    %11 = arith.cmpi ne, %10, %c0_i32_9 : i32
    scf.if %11 {
      %c0_10 = arith.constant 0 : index
      %c0_11 = arith.constant 0 : index
      %12 = vector.load %arg7[%c0_10, %c0_11] : memref<128x128xf32, #tpu.memory_space<vmem>>, vector<128x128xf32>
      %13 = arith.truncf %12 : vector<128x128xf32> to vector<128x128xbf16>
      %c0_12 = arith.constant 0 : index
      %c0_13 = arith.constant 0 : index
      %14 = vector.load %arg5[%c0_12, %c0_13] : memref<128x128xbf16, #tpu.memory_space<vmem>>, vector<128x128xbf16>
      tpu.vector_store %arg5[%c0_12, %c0_13], %13 {strides = array<i32>} : memref<128x128xbf16, #tpu.memory_space<vmem>>, vector<128x128xbf16>,
      %c0_14 = arith.constant 0 : index
      %c0_15 = arith.constant 0 : index
      %15 = vector.load %arg4[%c0_14, %c0_15] : memref<128x128xf32, #tpu.memory_space<vmem>>, vector<128x128xf32>
      %16 = arith.addf %15, %12 : vector<128x128xf32>
      %c0_16 = arith.constant 0 : index
      %c0_17 = arith.constant 0 : index
      %17 = vector.load %arg6[%c0_16, %c0_17] : memref<128x128xf32, #tpu.memory_space<vmem>>, vector<128x128xf32>
      tpu.vector_store %arg6[%c0_16, %c0_17], %16 {strides = array<i32>} : memref<128x128xf32, #tpu.memory_space<vmem>>, vector<128x128xf32>,
    } else {
    }
    return
  }
  func.func @transform_0(%arg0: i32, %arg1: i32) -> (i32, i32) {
    %c0_i32 = arith.constant 0 : i32
    return %arg0, %arg1 : i32, i32
  }
  func.func @transform_1(%arg0: i32, %arg1: i32) -> (i32, i32) {
    %c0_i32 = arith.constant 0 : i32
    %c0_i32_0 = arith.constant 0 : i32
    return %arg1, %c0_i32 : i32, i32
  }
  func.func @transform_2(%arg0: i32, %arg1: i32) -> (i32, i32) {
    %c0_i32 = arith.constant 0 : i32
    %c0_i32_0 = arith.constant 0 : i32
    return %arg0, %c0_i32 : i32, i32
  }
  func.func @transform_3(%arg0: i32, %arg1: i32) -> (i32, i32) {
    %c0_i32 = arith.constant 0 : i32
    %c0_i32_0 = arith.constant 0 : i32
    return %arg0, %c0_i32 : i32, i32
  }
  func.func @transform_4(%arg0: i32, %arg1: i32) -> (i32, i32) {
    %c0_i32 = arith.constant 0 : i32
    %c0_i32_0 = arith.constant 0 : i32
    return %arg0, %c0_i32 : i32, i32
  }
}

module attributes {stable_mosaic.version = 11 : i64} {
  func.func @_norm_scale_kernel(%arg0: i32, %arg1: memref<128x128xf32, #tpu.memory_space<vmem>>, %arg2: memref<128x128xf32, #tpu.memory_space<vmem>>) attributes {dimension_semantics = [#tpu.dimension_semantics<parallel>], iteration_bounds = array<i64: 1>, scalar_prefetch = 0 : i64, scratch_operands = 0 : i64, tpu.core_type = #tpu.core_type<tc>, window_params = [{transform_indices = @transform_0, window_bounds = array<i64: 128, 128>}, {transform_indices = @transform_1, window_bounds = array<i64: 128, 128>}]} {
    %c0 = arith.constant 0 : index
    %c0_0 = arith.constant 0 : index
    %0 = vector.load %arg1[%c0, %c0_0] : memref<128x128xf32, #tpu.memory_space<vmem>>, vector<128x128xf32>
    %1 = arith.mulf %0, %0 : vector<128x128xf32>
    %cst = arith.constant dense<0.000000e+00> : vector<128xf32>
    %2 = vector.multi_reduction <add>, %1, %cst [1] : vector<128x128xf32> to vector<128xf32>
    %3 = vector.shape_cast %2 : vector<128xf32> to vector<128x1xf32>
    %cst_1 = arith.constant 1.000000e-24 : f32
    %4 = vector.broadcast %cst_1 : f32 to vector<128x1xf32>
    %5 = arith.maximumf %3, %4 : vector<128x1xf32>
    %6 = math.rsqrt %5 : vector<128x1xf32>
    %7 = vector.broadcast %6 : vector<128x1xf32> to vector<128x128xf32>
    %8 = arith.mulf %0, %7 : vector<128x128xf32>
    %cst_2 = arith.constant 5.000000e-01 : f32
    %9 = vector.broadcast %cst_2 : f32 to vector<128x128xf32>
    %10 = arith.mulf %8, %9 : vector<128x128xf32>
    %c0_3 = arith.constant 0 : index
    %c0_4 = arith.constant 0 : index
    %11 = vector.load %arg2[%c0_3, %c0_4] : memref<128x128xf32, #tpu.memory_space<vmem>>, vector<128x128xf32>
    tpu.vector_store %arg2[%c0_3, %c0_4], %10 {strides = array<i32>} : memref<128x128xf32, #tpu.memory_space<vmem>>, vector<128x128xf32>,
    return
  }
  func.func @transform_0(%arg0: i32) -> (i32, i32) {
    %c0_i32 = arith.constant 0 : i32
    %c0_i32_0 = arith.constant 0 : i32
    return %arg0, %c0_i32 : i32, i32
  }
  func.func @transform_1(%arg0: i32) -> (i32, i32) {
    %c0_i32 = arith.constant 0 : i32
    %c0_i32_0 = arith.constant 0 : i32
    return %arg0, %c0_i32 : i32, i32
  }
}

</mosaic_0001>

<bundles_post_ra>
// kernel: _forward_impl.5
= control target key start
LH: loop header
LB: loop body
LE: loop exit
PB: predicated region body
PF: predicated region fallthrough
CT: control target
= control target key end

     0   :  { %s374_s0 = inlined_call_operand.vmem [shape: f32[128,128], index: 0, kind: input, shape index: {}]   ;;  %s375_s1 = inlined_call_operand.vmem [shape: f32[128,128], index: 1, kind: output, shape index: {}]  }
   0x1   :  { %v201_v0 = vld [vmem:[%s374_s0 + $0x10] sm:$0xff]  ;;  %v206_v1 = vld [vmem:[%s374_s0] sm:$0xff]  ;;  %v211_v2 = vld [vmem:[%s374_s0 + $0x18] sm:$0xff] }
   0x2   :  { %v26_v3 = vmul.f32 %v201_v0, %v201_v0  ;;  %v24_v4 = vmul.f32 %v206_v1, %v206_v1  ;;  %v220_v5 = vld [vmem:[%s374_s0 + $0x8] sm:$0xff]  ;;  %v27_v6 = vmul.f32 %v211_v2, %v211_v2  ;;  %v234_v9 = vld [vmem:[%s374_s0 + $0x20] sm:$0xff]  ;;  %v243_v12 = vld [vmem:[%s374_s0 + $0x38] sm:$0xff] }
   0x3   :  { %v25_v7 = vmul.f32 %v220_v5, %v220_v5  ;;  %v229_v8 = vld [vmem:[%s374_s0 + $0x28] sm:$0xff]  ;;  %v28_v11 = vmul.f32 %v234_v9, %v234_v9  ;;  %v248_v13 = vld [vmem:[%s374_s0 + $0x30] sm:$0xff]  ;;  %v31_v14 = vmul.f32 %v243_v12, %v243_v12  ;;  %v262_v17 = vld [vmem:[%s374_s0 + $0x40] sm:$0xff] }
   0x4   :  { %44 = vadd.xlane.f32.xlu1 %v26_v3  ;;  %40 = vadd.xlane.f32.xlu0 %v24_v4  ;;  %v29_v10 = vmul.f32 %v229_v8, %v229_v8  ;;  %v30_v15 = vmul.f32 %v248_v13, %v248_v13  ;;  %v257_v16 = vld [vmem:[%s374_s0 + $0x48] sm:$0xff]  ;;  %v32_v19 = vmul.f32 %v262_v17, %v262_v17  ;;  %v271_v20 = vld [vmem:[%s374_s0 + $0x58] sm:$0xff]  ;;  %v276_v21 = vld [vmem:[%s374_s0 + $0x50] sm:$0xff] }
   0x5   :  { %v33_v18 = vmul.f32 %v257_v16, %v257_v16  ;;  %v35_v22 = vmul.f32 %v271_v20, %v271_v20  ;;  %v34_v23 = vmul.f32 %v276_v21, %v276_v21  ;;  %v285_v24 = vld [vmem:[%s374_s0 + $0x68] sm:$0xff]  ;;  %v290_v25 = vld [vmem:[%s374_s0 + $0x60] sm:$0xff]  ;;  %v299_v28 = vld [vmem:[%s374_s0 + $0x78] sm:$0xff] }
   0x6   :  { %v37_v26 = vmul.f32 %v285_v24, %v285_v24  ;;  %v36_v27 = vmul.f32 %v290_v25, %v290_v25  ;;  %v304_v29 = vld [vmem:[%s374_s0 + $0x70] sm:$0xff]  ;;  %v39_v30 = vmul.f32 %v299_v28, %v299_v28 }
   0x7   :  { %v38_v31 = vmul.f32 %v304_v29, %v304_v29 }
   0x8   :  { %46 = vadd.xlane.f32.xlu1 %v27_v6  ;;  %42 = vadd.xlane.f32.xlu0 %v25_v7 }
   0xc   :  { %50 = vadd.xlane.f32.xlu1 %v29_v10  ;;  %48 = vadd.xlane.f32.xlu0 %v28_v11 }
  0x10   :  { %54 = vadd.xlane.f32.xlu1 %v31_v14  ;;  %52 = vadd.xlane.f32.xlu0 %v30_v15 }
  0x14   :  { %58 = vadd.xlane.f32.xlu1 %v33_v18  ;;  %56 = vadd.xlane.f32.xlu0 %v32_v19 }
  0x18   :  { %62 = vadd.xlane.f32.xlu1 %v35_v22  ;;  %60 = vadd.xlane.f32.xlu0 %v34_v23 }
  0x1c   :  { %66 = vadd.xlane.f32.xlu1 %v37_v26  ;;  %64 = vadd.xlane.f32.xlu0 %v36_v27 }
  0x20   :  { %70 = vadd.xlane.f32.xlu1 %v39_v30  ;;  %68 = vadd.xlane.f32.xlu0 %v38_v31 }
  0x8d   :  { %v45_v32 = vpop.xlane.xlu1 %44  ;;  %v41_v33 = vpop.xlane.xlu0 %40 }
  0x8e   :  { %v74_v34 = vmax.f32 %v45_v32, 1e-24  ;;  %v72_v35 = vmax.f32 %v41_v33, 1e-24 }
  0x90   :  { %156 = vrsqrt.f32 %v74_v34 }
  0x91   :  { %158 = vrsqrt.f32 %v72_v35  ;;  %v47_v36 = vpop.xlane.xlu1 %46  ;;  %v43_v37 = vpop.xlane.xlu0 %42 }
  0x92   :  { %v75_v38 = vmax.f32 %v47_v36, 1e-24  ;;  %v73_v39 = vmax.f32 %v43_v37, 1e-24 }
  0x94   :  { %160 = vrsqrt.f32 %v75_v38 }
  0x95   :  { %162 = vrsqrt.f32 %v73_v39  ;;  %v51_v40 = vpop.xlane.xlu1 %50  ;;  %v49_v41 = vpop.xlane.xlu0 %48 }
  0x96   :  { %v77_v42 = vmax.f32 %v51_v40, 1e-24  ;;  %v76_v43 = vmax.f32 %v49_v41, 1e-24 }
  0x98   :  { %164 = vrsqrt.f32 %v77_v42 }
  0x99   :  { %166 = vrsqrt.f32 %v76_v43  ;;  %v55_v44 = vpop.xlane.xlu1 %54  ;;  %v53_v45 = vpop.xlane.xlu0 %52 }
  0x9a   :  { %v79_v46 = vmax.f32 %v55_v44, 1e-24  ;;  %v78_v47 = vmax.f32 %v53_v45, 1e-24 }
  0x9c   :  { %168 = vrsqrt.f32 %v79_v46 }
  0x9d   :  { %v157_v48 = vpop.eup %156  ;;  %170 = vrsqrt.f32 %v78_v47  ;;  %v59_v49 = vpop.xlane.xlu1 %58 }
  0x9e   :  { %v57_v50 = vpop.xlane.xlu0 %56  ;;  %v159_v51 = vpop.eup %158  ;;  %v106_v52 = vmul.f32 %v157_v48, %v201_v0  ;;  %v81_v53 = vmax.f32 %v59_v49, 1e-24 }
  0x9f   :  { %v80_v54 = vmax.f32 %v57_v50, 1e-24  ;;  %v104_v55 = vmul.f32 %v159_v51, %v206_v1 }
  0xa0   :  { %v122_v56 = vmul.f32 0.5, %v106_v52  ;;  %172 = vrsqrt.f32 %v81_v53 }
  0xa1   :  { %v161_v57 = vpop.eup %160  ;;  %v120_v58 = vmul.f32 0.5, %v104_v55  ;;  %174 = vrsqrt.f32 %v80_v54  ;;  %v63_v59 = vpop.xlane.xlu1 %62 }
  0xa2   :  { %v61_v60 = vpop.xlane.xlu0 %60  ;;  %v163_v61 = vpop.eup %162  ;;  %138 = vst [vmem:[%s375_s1 + $0x10] sm:$0xff] %v122_v56  ;;  %v107_v62 = vmul.f32 %v161_v57, %v211_v2  ;;  %v83_v63 = vmax.f32 %v63_v59, 1e-24 }
  0xa3   :  { %v82_v0 = vmax.f32 %v61_v60, 1e-24  ;;  %136 = vst [vmem:[%s375_s1] sm:$0xff] %v120_v58  ;;  %v105_v1 = vmul.f32 %v163_v61, %v220_v5 }
  0xa4   :  { %v123_v3 = vmul.f32 0.5, %v107_v62  ;;  %176 = vrsqrt.f32 %v83_v63 }
  0xa5   :  { %v165_v4 = vpop.eup %164  ;;  %v121_v6 = vmul.f32 0.5, %v105_v1  ;;  %178 = vrsqrt.f32 %v82_v0  ;;  %v67_v7 = vpop.xlane.xlu1 %66 }
  0xa6   :  { %v65_v10 = vpop.xlane.xlu0 %64  ;;  %v167_v11 = vpop.eup %166  ;;  %139 = vst [vmem:[%s375_s1 + $0x18] sm:$0xff] %v123_v3  ;;  %v109_v2 = vmul.f32 %v165_v4, %v229_v8  ;;  %v85_v14 = vmax.f32 %v67_v7, 1e-24 }
  0xa7   :  { %v84_v15 = vmax.f32 %v65_v10, 1e-24  ;;  %137 = vst [vmem:[%s375_s1 + $0x8] sm:$0xff] %v121_v6  ;;  %v108_v5 = vmul.f32 %v167_v11, %v234_v9 }
  0xa8   :  { %v125_v18 = vmul.f32 0.5, %v109_v2  ;;  %180 = vrsqrt.f32 %v85_v14 }
  0xa9   :  { %v169_v19 = vpop.eup %168  ;;  %v124_v22 = vmul.f32 0.5, %v108_v5  ;;  %182 = vrsqrt.f32 %v84_v15  ;;  %v71_v23 = vpop.xlane.xlu1 %70 }
  0xaa   :  { %v69_v26 = vpop.xlane.xlu0 %68  ;;  %v171_v27 = vpop.eup %170  ;;  %141 = vst [vmem:[%s375_s1 + $0x28] sm:$0xff] %v125_v18  ;;  %v111_v8 = vmul.f32 %v169_v19, %v243_v12  ;;  %v87_v30 = vmax.f32 %v71_v23, 1e-24 }
  0xab   :  { %v86_v31 = vmax.f32 %v69_v26, 1e-24  ;;  %140 = vst [vmem:[%s375_s1 + $0x20] sm:$0xff] %v124_v22  ;;  %v110_v9 = vmul.f32 %v171_v27, %v248_v13 }
  0xac   :  { %v127_v32 = vmul.f32 0.5, %v111_v8  ;;  %184 = vrsqrt.f32 %v87_v30 }
  0xad   :  { %v173_v33 = vpop.eup %172  ;;  %v126_v34 = vmul.f32 0.5, %v110_v9  ;;  %186 = vrsqrt.f32 %v86_v31 }
  0xae   :  { %v175_v35 = vpop.eup %174  ;;  %143 = vst [vmem:[%s375_s1 + $0x38] sm:$0xff] %v127_v32  ;;  %v113_v12 = vmul.f32 %v173_v33, %v257_v16 }
  0xaf   :  { %142 = vst [vmem:[%s375_s1 + $0x30] sm:$0xff] %v126_v34  ;;  %v112_v36 = vmul.f32 %v175_v35, %v262_v17 }
  0xb0   :  { %v129_v37 = vmul.f32 0.5, %v113_v12 }
  0xb1   :  { %v177_v13 = vpop.eup %176  ;;  %v128_v38 = vmul.f32 0.5, %v112_v36 }
  0xb2   :  { %v179_v39 = vpop.eup %178  ;;  %145 = vst [vmem:[%s375_s1 + $0x48] sm:$0xff] %v129_v37  ;;  %v115_v40 = vmul.f32 %v177_v13, %v271_v20 }
  0xb3   :  { %144 = vst [vmem:[%s375_s1 + $0x40] sm:$0xff] %v128_v38  ;;  %v114_v16 = vmul.f32 %v179_v39, %v276_v21 }
  0xb4   :  { %v131_v41 = vmul.f32 0.5, %v115_v40 }
  0xb5   :  { %v181_v42 = vpop.eup %180  ;;  %v130_v43 = vmul.f32 0.5, %v114_v16 }
  0xb6   :  { %v183_v17 = vpop.eup %182  ;;  %147 = vst [vmem:[%s375_s1 + $0x58] sm:$0xff] %v131_v41  ;;  %v117_v44 = vmul.f32 %v181_v42, %v285_v24 }
  0xb7   :  { %146 = vst [vmem:[%s375_s1 + $0x50] sm:$0xff] %v130_v43  ;;  %v116_v20 = vmul.f32 %v183_v17, %v290_v25 }
  0xb8   :  { %v133_v45 = vmul.f32 0.5, %v117_v44 }
  0xb9   :  { %v185_v46 = vpop.eup %184  ;;  %v132_v47 = vmul.f32 0.5, %v116_v20 }
  0xba   :  { %v187_v21 = vpop.eup %186  ;;  %149 = vst [vmem:[%s375_s1 + $0x68] sm:$0xff] %v133_v45  ;;  %v119_v48 = vmul.f32 %v185_v46, %v299_v28 }
  0xbb   :  { %148 = vst [vmem:[%s375_s1 + $0x60] sm:$0xff] %v132_v47  ;;  %v118_v24 = vmul.f32 %v187_v21, %v304_v29 }
  0xbc   :  { %v135_v49 = vmul.f32 0.5, %v119_v48 }
  0xbd   :  { %v134_v50 = vmul.f32 0.5, %v118_v24 }
  0xbe   :  { %151 = vst [vmem:[%s375_s1 + $0x78] sm:$0xff] %v135_v49 }
  0xbf   :  { %150 = vst [vmem:[%s375_s1 + $0x70] sm:$0xff] %v134_v50 }

// kernel: _forward_impl.4
= control target key start
LH: loop header
LB: loop body
LE: loop exit
PB: predicated region body
PF: predicated region fallthrough
CT: control target
= control target key end

     0   :  { %s655_s1 = inlined_call_operand.vmem [shape: bf16[128,128], index: 1, kind: input, shape index: {}]   ;;  %s656_s0 = inlined_call_operand.vmem [shape: bf16[128,128], index: 0, kind: input, shape index: {}]   ;;  %s657_s2 = inlined_call_operand.vmem [shape: f32[128,128], index: 2, kind: input, shape index: {}]   ;;  %s658_s3 = inlined_call_operand.vmem [shape: f32[128,128], index: 3, kind: output, shape index: {}]  }
   0x1   :  { %v475_v0 = vld [vmem:[%s655_s1 + $0x38] sm:$0xff]   ;;  %v476_v1 = vld [vmem:[%s655_s1 + $0x30] sm:$0xff]   ;;  %v477_v2 = vld [vmem:[%s655_s1 + $0x28] sm:$0xff]  }
   0x2   :  { %427 = vmatprep.subr.bf16.mxu0 %v475_v0  ;;  %459 = vmatprep.subr.bf16.mxu1 %v475_v0  ;;  %v478_v3 = vld [vmem:[%s655_s1 + $0x20] sm:$0xff]   ;;  %v479_v6 = vld [vmem:[%s655_s1 + $0x18] sm:$0xff]   ;;  %v480_v7 = vld [vmem:[%s655_s1 + $0x10] sm:$0xff]  }
   0x3   :  { %428 = vmatpush3.bf16.msra.mxu0 %v475_v0  ;;  %467 = vmatpush3.bf16.msra.mxu1 %v475_v0  ;;  %v483_v4 = vld [vmem:[%s656_s0] sm:$0xff]   ;;  %v481_v8 = vld [vmem:[%s655_s1 + $0x8] sm:$0xff]   ;;  %v487_v12 = vld [vmem:[%s656_s0 + $0x10] sm:$0xff]  }
   0x4   :  { %429 = vmatprep.subr.bf16.mxu0 %v476_v1  ;;  %460 = vmatprep.subr.bf16.mxu1 %v476_v1  ;;  %v484_v5 = vld [vmem:[%s656_s0 + $0x20] sm:$0xff]   ;;  %v485_v10 = vld [vmem:[%s656_s0 + $0x8] sm:$0xff]   ;;  %v488_v13 = vld [vmem:[%s656_s0 + $0x30] sm:$0xff]  }
   0x5   :  { %443 = vmatprep.mubr.bf16.mxu0 %v483_v4  ;;  %451 = vmatprep.mubr.bf16.mxu1 %v484_v5  ;;  %v482_v9 = vld [vmem:[%s655_s1] sm:$0xff]   ;;  %v486_v11 = vld [vmem:[%s656_s0 + $0x28] sm:$0xff]   ;;  %v489_v14 = vld [vmem:[%s656_s0 + $0x18] sm:$0xff]  }
   0x6   :  { %v490_v15 = vld [vmem:[%s656_s0 + $0x38] sm:$0xff]   ;;  %v329_v16 = vld [vmem:[%s657_s2 + $0x10] sm:$0xff]  ;;  %v327_v20 = vld [vmem:[%s657_s2] sm:$0xff] }
   0x7   :  { %430 = vmatpush3.bf16.msra.mxu0 %v476_v1  ;;  %468 = vmatpush3.bf16.msra.mxu1 %v476_v1  ;;  %v337_v17 = vld [vmem:[%s657_s2 + $0x50] sm:$0xff]  ;;  %v335_v21 = vld [vmem:[%s657_s2 + $0x40] sm:$0xff]  ;;  %v330_v26 = vld [vmem:[%s657_s2 + $0x18] sm:$0xff] }
   0x8   :  { %431 = vmatprep.subr.bf16.mxu0 %v477_v2  ;;  %461 = vmatprep.subr.bf16.mxu1 %v477_v2  ;;  %v338_v27 = vld [vmem:[%s657_s2 + $0x58] sm:$0xff]  ;;  %v328_v34 = vld [vmem:[%s657_s2 + $0x8] sm:$0xff]  ;;  %v333_v42 = vld [vmem:[%s657_s2 + $0x30] sm:$0xff] }
   0x9   :  { %v336_v35 = vld [vmem:[%s657_s2 + $0x48] sm:$0xff]  ;;  %v341_v43 = vld [vmem:[%s657_s2 + $0x70] sm:$0xff]  ;;  %v331_v50 = vld [vmem:[%s657_s2 + $0x20] sm:$0xff] }
   0xa   :  { %v339_v51 = vld [vmem:[%s657_s2 + $0x60] sm:$0xff]  ;;  %v334_v58 = vld [vmem:[%s657_s2 + $0x38] sm:$0xff] }
   0xb   :  { %432 = vmatpush3.bf16.msra.mxu0 %v477_v2  ;;  %469 = vmatpush3.bf16.msra.mxu1 %v477_v2  ;;  %v342_v59 = vld [vmem:[%s657_s2 + $0x78] sm:$0xff]  ;;  %v332_v2 = vld [vmem:[%s657_s2 + $0x28] sm:$0xff] }
   0xc   :  { %433 = vmatprep.subr.bf16.mxu0 %v478_v3  ;;  %462 = vmatprep.subr.bf16.mxu1 %v478_v3 }
   0xf   :  { %434 = vmatpush3.bf16.msra.mxu0 %v478_v3  ;;  %470 = vmatpush3.bf16.msra.mxu1 %v478_v3  ;;  %v340_v3 = vld [vmem:[%s657_s2 + $0x68] sm:$0xff] }
  0x10   :  { %435 = vmatprep.subr.bf16.mxu0 %v479_v6  ;;  %463 = vmatprep.subr.bf16.mxu1 %v479_v6 }
  0x13   :  { %436 = vmatpush3.bf16.msra.mxu0 %v479_v6  ;;  %471 = vmatpush3.bf16.msra.mxu1 %v479_v6 }
  0x14   :  { %437 = vmatprep.subr.bf16.mxu0 %v480_v7  ;;  %464 = vmatprep.subr.bf16.mxu1 %v480_v7 }
  0x17   :  { %438 = vmatpush3.bf16.msra.mxu0 %v480_v7  ;;  %472 = vmatpush3.bf16.msra.mxu1 %v480_v7 }
  0x18   :  { %439 = vmatprep.subr.bf16.mxu0 %v481_v8  ;;  %465 = vmatprep.subr.bf16.mxu1 %v481_v8 }
  0x1b   :  { %440 = vmatpush3.bf16.msra.mxu0 %v481_v8  ;;  %473 = vmatpush3.bf16.msra.mxu1 %v481_v8 }
  0x1c   :  { %441 = vmatprep.subr.bf16.mxu0 %v482_v9  ;;  %466 = vmatprep.subr.bf16.mxu1 %v482_v9 }
  0x1f   :  { %442 = vmatpush3.bf16.msra.mxu0 %v482_v9  ;;  %474 = vmatpush3.bf16.msra.mxu1 %v482_v9 }
  0x22   :  { %444 = vmatmul.mubr.bf16.vlgmr.msra.gmra.mxu0 %v485_v10  ;;  %452 = vmatmul.mubr.bf16.vlgmr.msra.gmra.mxu1 %v486_v11 }
  0x23   :  { %447 = vmatprep.mubr.bf16.mxu0 %v487_v12  ;;  %455 = vmatprep.mubr.bf16.mxu1 %v488_v13 }
  0x2a   :  { %448 = vmatmul.mubr.bf16.gmra.mxu0 %v489_v14  ;;  %456 = vmatmul.mubr.bf16.gmra.mxu1 %v490_v15 }
  0xe2   :  { %v445_v18 = vpop.f32.mrf.mxu0  ;;  %v453_v19 = vpop.f32.mrf.mxu1 }
  0xe3   :  { %v345_v22 = vadd.f32 %v445_v18, %v329_v16  ;;  %v353_v23 = vadd.f32 %v453_v19, %v337_v17 }
  0xe4   :  { %v213_v24 = vpop.f32.mrf.mxu0  ;;  %v245_v25 = vpop.f32.mrf.mxu1 }
  0xe5   :  { %v361_v28 = vmul.f32 0.5, %v345_v22  ;;  %v369_v29 = vmul.f32 0.5, %v353_v23  ;;  %v343_v30 = vadd.f32 %v327_v20, %v213_v24  ;;  %v351_v31 = vadd.f32 %v335_v21, %v245_v25 }
  0xe6   :  { %v446_v32 = vpop.f32.mrf.mxu0  ;;  %v454_v33 = vpop.f32.mrf.mxu1 }
  0xe7   :  { %377 = vst [vmem:[%s658_s3 + $0x10] sm:$0xff] %v361_v28  ;;  %385 = vst [vmem:[%s658_s3 + $0x50] sm:$0xff] %v369_v29  ;;  %v359_v36 = vmul.f32 0.5, %v343_v30  ;;  %v367_v37 = vmul.f32 0.5, %v351_v31  ;;  %v346_v38 = vadd.f32 %v446_v32, %v330_v26  ;;  %v354_v39 = vadd.f32 %v454_v33, %v338_v27 }
  0xe8   :  { %v216_v40 = vpop.f32.mrf.mxu0  ;;  %v248_v41 = vpop.f32.mrf.mxu1 }
  0xe9   :  { %375 = vst [vmem:[%s658_s3] sm:$0xff] %v359_v36  ;;  %383 = vst [vmem:[%s658_s3 + $0x40] sm:$0xff] %v367_v37  ;;  %v362_v44 = vmul.f32 0.5, %v346_v38  ;;  %v370_v45 = vmul.f32 0.5, %v354_v39  ;;  %v344_v46 = vadd.f32 %v328_v34, %v216_v40  ;;  %v352_v47 = vadd.f32 %v336_v35, %v248_v41 }
  0xea   :  { %v449_v48 = vpop.f32.mrf.mxu0  ;;  %v457_v49 = vpop.f32.mrf.mxu1 }
  0xeb   :  { %378 = vst [vmem:[%s658_s3 + $0x18] sm:$0xff] %v362_v44  ;;  %386 = vst [vmem:[%s658_s3 + $0x58] sm:$0xff] %v370_v45  ;;  %v360_v52 = vmul.f32 0.5, %v344_v46  ;;  %v368_v53 = vmul.f32 0.5, %v352_v47  ;;  %v349_v54 = vadd.f32 %v449_v48, %v333_v42  ;;  %v357_v55 = vadd.f32 %v457_v49, %v341_v43 }
  0xec   :  { %v229_v56 = vpop.f32.mrf.mxu0  ;;  %v261_v57 = vpop.f32.mrf.mxu1 }
  0xed   :  { %376 = vst [vmem:[%s658_s3 + $0x8] sm:$0xff] %v360_v52  ;;  %384 = vst [vmem:[%s658_s3 + $0x48] sm:$0xff] %v368_v53  ;;  %v365_v60 = vmul.f32 0.5, %v349_v54  ;;  %v373_v61 = vmul.f32 0.5, %v357_v55  ;;  %v347_v62 = vadd.f32 %v331_v50, %v229_v56  ;;  %v355_v63 = vadd.f32 %v339_v51, %v261_v57 }
  0xee   :  { %v450_v0 = vpop.f32.mrf.mxu0  ;;  %v458_v1 = vpop.f32.mrf.mxu1 }
  0xef   :  { %381 = vst [vmem:[%s658_s3 + $0x30] sm:$0xff] %v365_v60  ;;  %389 = vst [vmem:[%s658_s3 + $0x70] sm:$0xff] %v373_v61  ;;  %v363_v4 = vmul.f32 0.5, %v347_v62  ;;  %v371_v5 = vmul.f32 0.5, %v355_v63  ;;  %v350_v6 = vadd.f32 %v450_v0, %v334_v58  ;;  %v358_v7 = vadd.f32 %v458_v1, %v342_v59 }
  0xf0   :  { %v232_v8 = vpop.f32.mrf.mxu0  ;;  %v264_v9 = vpop.f32.mrf.mxu1 }
  0xf1   :  { %379 = vst [vmem:[%s658_s3 + $0x20] sm:$0xff] %v363_v4  ;;  %387 = vst [vmem:[%s658_s3 + $0x60] sm:$0xff] %v371_v5  ;;  %v366_v10 = vmul.f32 0.5, %v350_v6  ;;  %v374_v11 = vmul.f32 0.5, %v358_v7  ;;  %v348_v12 = vadd.f32 %v332_v2, %v232_v8  ;;  %v356_v13 = vadd.f32 %v340_v3, %v264_v9 }
  0xf3   :  { %382 = vst [vmem:[%s658_s3 + $0x38] sm:$0xff] %v366_v10  ;;  %390 = vst [vmem:[%s658_s3 + $0x78] sm:$0xff] %v374_v11  ;;  %v364_v14 = vmul.f32 0.5, %v348_v12  ;;  %v372_v15 = vmul.f32 0.5, %v356_v13 }
  0xf5   :  { %380 = vst [vmem:[%s658_s3 + $0x28] sm:$0xff] %v364_v14  ;;  %388 = vst [vmem:[%s658_s3 + $0x68] sm:$0xff] %v372_v15 }

// kernel: _forward_impl.3
= control target key start
LH: loop header
LB: loop body
LE: loop exit
PB: predicated region body
PF: predicated region fallthrough
CT: control target
= control target key end

     0   :  { %s833_s1 = inlined_call_operand.vmem [shape: bf16[128,128], index: 1, kind: input, shape index: {}]   ;;  %s834_s0 = inlined_call_operand.vmem [shape: bf16[128,128], index: 0, kind: input, shape index: {}]   ;;  %s835_s2 = inlined_call_operand.vmem [shape: f32[128,128], index: 2, kind: input, shape index: {}]   ;;  %s836_s4 = inlined_call_operand.vmem [shape: f32[128,128], index: 4, kind: output, shape index: {1}]   ;;  %s837_s3 = inlined_call_operand.vmem [shape: bf16[128,128], index: 3, kind: output, shape index: {0}]  }
   0x1   :  { %v624_v0 = vld [vmem:[%s833_s1 + $0x38] sm:$0xff]   ;;  %v625_v1 = vld [vmem:[%s833_s1 + $0x30] sm:$0xff]   ;;  %v626_v2 = vld [vmem:[%s833_s1 + $0x28] sm:$0xff]  }
   0x2   :  { %576 = vmatprep.subr.bf16.mxu0 %v624_v0  ;;  %608 = vmatprep.subr.bf16.mxu1 %v624_v0  ;;  %v627_v3 = vld [vmem:[%s833_s1 + $0x20] sm:$0xff]   ;;  %v628_v6 = vld [vmem:[%s833_s1 + $0x18] sm:$0xff]   ;;  %v629_v7 = vld [vmem:[%s833_s1 + $0x10] sm:$0xff]  }
   0x3   :  { %577 = vmatpush3.bf16.msra.mxu0 %v624_v0  ;;  %616 = vmatpush3.bf16.msra.mxu1 %v624_v0  ;;  %v632_v4 = vld [vmem:[%s834_s0] sm:$0xff]   ;;  %v630_v8 = vld [vmem:[%s833_s1 + $0x8] sm:$0xff]   ;;  %v636_v12 = vld [vmem:[%s834_s0 + $0x10] sm:$0xff]  }
   0x4   :  { %578 = vmatprep.subr.bf16.mxu0 %v625_v1  ;;  %609 = vmatprep.subr.bf16.mxu1 %v625_v1  ;;  %v633_v5 = vld [vmem:[%s834_s0 + $0x20] sm:$0xff]   ;;  %v634_v10 = vld [vmem:[%s834_s0 + $0x8] sm:$0xff]   ;;  %v637_v13 = vld [vmem:[%s834_s0 + $0x30] sm:$0xff]  }
   0x5   :  { %592 = vmatprep.mubr.bf16.mxu0 %v632_v4  ;;  %600 = vmatprep.mubr.bf16.mxu1 %v633_v5  ;;  %v631_v9 = vld [vmem:[%s833_s1] sm:$0xff]   ;;  %v635_v11 = vld [vmem:[%s834_s0 + $0x28] sm:$0xff]   ;;  %v638_v14 = vld [vmem:[%s834_s0 + $0x18] sm:$0xff]  }
   0x6   :  { %v639_v15 = vld [vmem:[%s834_s0 + $0x38] sm:$0xff]   ;;  %v411_v16 = vld [vmem:[%s835_s2 + $0x10] sm:$0xff]  ;;  %v409_v20 = vld [vmem:[%s835_s2] sm:$0xff] }
   0x7   :  { %579 = vmatpush3.bf16.msra.mxu0 %v625_v1  ;;  %617 = vmatpush3.bf16.msra.mxu1 %v625_v1  ;;  %v419_v17 = vld [vmem:[%s835_s2 + $0x50] sm:$0xff]  ;;  %v417_v21 = vld [vmem:[%s835_s2 + $0x40] sm:$0xff]  ;;  %v412_v26 = vld [vmem:[%s835_s2 + $0x18] sm:$0xff] }
   0x8   :  { %580 = vmatprep.subr.bf16.mxu0 %v626_v2  ;;  %610 = vmatprep.subr.bf16.mxu1 %v626_v2  ;;  %v420_v27 = vld [vmem:[%s835_s2 + $0x58] sm:$0xff]  ;;  %v410_v32 = vld [vmem:[%s835_s2 + $0x8] sm:$0xff]  ;;  %v415_v40 = vld [vmem:[%s835_s2 + $0x30] sm:$0xff] }
   0x9   :  { %v418_v33 = vld [vmem:[%s835_s2 + $0x48] sm:$0xff]  ;;  %v423_v41 = vld [vmem:[%s835_s2 + $0x70] sm:$0xff]  ;;  %v413_v48 = vld [vmem:[%s835_s2 + $0x20] sm:$0xff] }
   0xa   :  { %v421_v49 = vld [vmem:[%s835_s2 + $0x60] sm:$0xff]  ;;  %v416_v54 = vld [vmem:[%s835_s2 + $0x38] sm:$0xff]  ;;  %v414_v60 = vld [vmem:[%s835_s2 + $0x28] sm:$0xff] }
   0xb   :  { %581 = vmatpush3.bf16.msra.mxu0 %v626_v2  ;;  %618 = vmatpush3.bf16.msra.mxu1 %v626_v2  ;;  %v424_v55 = vld [vmem:[%s835_s2 + $0x78] sm:$0xff]  ;;  %v422_v61 = vld [vmem:[%s835_s2 + $0x68] sm:$0xff] }
   0xc   :  { %582 = vmatprep.subr.bf16.mxu0 %v627_v3  ;;  %611 = vmatprep.subr.bf16.mxu1 %v627_v3 }
   0xf   :  { %583 = vmatpush3.bf16.msra.mxu0 %v627_v3  ;;  %619 = vmatpush3.bf16.msra.mxu1 %v627_v3 }
  0x10   :  { %584 = vmatprep.subr.bf16.mxu0 %v628_v6  ;;  %612 = vmatprep.subr.bf16.mxu1 %v628_v6 }
  0x13   :  { %585 = vmatpush3.bf16.msra.mxu0 %v628_v6  ;;  %620 = vmatpush3.bf16.msra.mxu1 %v628_v6 }
  0x14   :  { %586 = vmatprep.subr.bf16.mxu0 %v629_v7  ;;  %613 = vmatprep.subr.bf16.mxu1 %v629_v7 }
  0x17   :  { %587 = vmatpush3.bf16.msra.mxu0 %v629_v7  ;;  %621 = vmatpush3.bf16.msra.mxu1 %v629_v7 }
  0x18   :  { %588 = vmatprep.subr.bf16.mxu0 %v630_v8  ;;  %614 = vmatprep.subr.bf16.mxu1 %v630_v8 }
  0x1b   :  { %589 = vmatpush3.bf16.msra.mxu0 %v630_v8  ;;  %622 = vmatpush3.bf16.msra.mxu1 %v630_v8 }
  0x1c   :  { %590 = vmatprep.subr.bf16.mxu0 %v631_v9  ;;  %615 = vmatprep.subr.bf16.mxu1 %v631_v9 }
  0x1f   :  { %591 = vmatpush3.bf16.msra.mxu0 %v631_v9  ;;  %623 = vmatpush3.bf16.msra.mxu1 %v631_v9 }
  0x22   :  { %593 = vmatmul.mubr.bf16.vlgmr.msra.gmra.mxu0 %v634_v10  ;;  %601 = vmatmul.mubr.bf16.vlgmr.msra.gmra.mxu1 %v635_v11 }
  0x23   :  { %596 = vmatprep.mubr.bf16.mxu0 %v636_v12  ;;  %604 = vmatprep.mubr.bf16.mxu1 %v637_v13 }
  0x2a   :  { %597 = vmatmul.mubr.bf16.gmra.mxu0 %v638_v14  ;;  %605 = vmatmul.mubr.bf16.gmra.mxu1 %v639_v15 }
  0xe2   :  { %v594_v18 = vpop.f32.mrf.mxu0  ;;  %v602_v19 = vpop.f32.mrf.mxu1 }
  0xe3   :  { %v427_v22 = vadd.f32 %v594_v18, %v411_v16  ;;  %v435_v23 = vadd.f32 %v602_v19, %v419_v17 }
  0xe4   :  { %v215_v24 = vpop.f32.mrf.mxu0  ;;  %v247_v25 = vpop.f32.mrf.mxu1 }
  0xe5   :  { %443 = vst [vmem:[%s836_s4 + $0x10] sm:$0xff] %v427_v22  ;;  %451 = vst [vmem:[%s836_s4 + $0x50] sm:$0xff] %v435_v23  ;;  %v425_v28 = vadd.f32 %v409_v20, %v215_v24  ;;  %v433_v29 = vadd.f32 %v417_v21, %v247_v25 }
  0xe6   :  { %v595_v30 = vpop.f32.mrf.mxu0  ;;  %v603_v31 = vpop.f32.mrf.mxu1 }
  0xe7   :  { %441 = vst [vmem:[%s836_s4] sm:$0xff] %v425_v28  ;;  %449 = vst [vmem:[%s836_s4 + $0x40] sm:$0xff] %v433_v29  ;;  %v521_v34 = vpack.c.bf16 %v595_v30, %v594_v18  ;;  %v428_v35 = vadd.f32 %v595_v30, %v412_v26  ;;  %v541_v36 = vpack.c.bf16 %v603_v31, %v602_v19 }
  0xe8   :  { %v436_v37 = vadd.f32 %v603_v31, %v420_v27  ;;  %v218_v38 = vpop.f32.mrf.mxu0  ;;  %v250_v39 = vpop.f32.mrf.mxu1 }
  0xe9   :  { %553 = vst [vmem:[%s837_s3 + $0x8] sm:$0xff] %v521_v34   ;;  %444 = vst [vmem:[%s836_s4 + $0x18] sm:$0xff] %v428_v35  ;;  %v516_v42 = vpack.c.bf16 %v218_v38, %v215_v24  ;;  %v426_v43 = vadd.f32 %v410_v32, %v218_v38  ;;  %v536_v44 = vpack.c.bf16 %v250_v39, %v247_v25 }
  0xea   :  { %557 = vst [vmem:[%s837_s3 + $0x28] sm:$0xff] %v541_v36   ;;  %452 = vst [vmem:[%s836_s4 + $0x58] sm:$0xff] %v436_v37  ;;  %v434_v45 = vadd.f32 %v418_v33, %v250_v39  ;;  %v598_v46 = vpop.f32.mrf.mxu0  ;;  %v606_v47 = vpop.f32.mrf.mxu1 }
  0xeb   :  { %517 = vst [vmem:[%s837_s3] sm:$0xff] %v516_v42   ;;  %442 = vst [vmem:[%s836_s4 + $0x8] sm:$0xff] %v426_v43  ;;  %v431_v50 = vadd.f32 %v598_v46, %v415_v40  ;;  %v439_v51 = vadd.f32 %v606_v47, %v423_v41 }
  0xec   :  { %556 = vst [vmem:[%s837_s3 + $0x20] sm:$0xff] %v536_v44   ;;  %450 = vst [vmem:[%s836_s4 + $0x48] sm:$0xff] %v434_v45  ;;  %v231_v52 = vpop.f32.mrf.mxu0  ;;  %v263_v53 = vpop.f32.mrf.mxu1 }
  0xed   :  { %447 = vst [vmem:[%s836_s4 + $0x30] sm:$0xff] %v431_v50  ;;  %455 = vst [vmem:[%s836_s4 + $0x70] sm:$0xff] %v439_v51  ;;  %v429_v56 = vadd.f32 %v413_v48, %v231_v52  ;;  %v437_v57 = vadd.f32 %v421_v49, %v263_v53 }
  0xee   :  { %v599_v58 = vpop.f32.mrf.mxu0  ;;  %v607_v59 = vpop.f32.mrf.mxu1 }
  0xef   :  { %445 = vst [vmem:[%s836_s4 + $0x20] sm:$0xff] %v429_v56  ;;  %453 = vst [vmem:[%s836_s4 + $0x60] sm:$0xff] %v437_v57  ;;  %v531_v62 = vpack.c.bf16 %v599_v58, %v598_v46  ;;  %v432_v63 = vadd.f32 %v599_v58, %v416_v54  ;;  %v551_v0 = vpack.c.bf16 %v607_v59, %v606_v47 }
  0xf0   :  { %v440_v1 = vadd.f32 %v607_v59, %v424_v55  ;;  %v234_v2 = vpop.f32.mrf.mxu0  ;;  %v266_v3 = vpop.f32.mrf.mxu1 }
  0xf1   :  { %555 = vst [vmem:[%s837_s3 + $0x18] sm:$0xff] %v531_v62   ;;  %448 = vst [vmem:[%s836_s4 + $0x38] sm:$0xff] %v432_v63  ;;  %v526_v4 = vpack.c.bf16 %v234_v2, %v231_v52  ;;  %v430_v5 = vadd.f32 %v414_v60, %v234_v2  ;;  %v546_v6 = vpack.c.bf16 %v266_v3, %v263_v53 }
  0xf2   :  { %559 = vst [vmem:[%s837_s3 + $0x38] sm:$0xff] %v551_v0   ;;  %456 = vst [vmem:[%s836_s4 + $0x78] sm:$0xff] %v440_v1  ;;  %v438_v7 = vadd.f32 %v422_v61, %v266_v3 }
  0xf3   :  { %554 = vst [vmem:[%s837_s3 + $0x10] sm:$0xff] %v526_v4   ;;  %446 = vst [vmem:[%s836_s4 + $0x28] sm:$0xff] %v430_v5 }
  0xf4   :  { %558 = vst [vmem:[%s837_s3 + $0x30] sm:$0xff] %v546_v6   ;;  %454 = vst [vmem:[%s836_s4 + $0x68] sm:$0xff] %v438_v7 }

</bundles_post_ra>
